<compile_context>
chip_gen: v7x
topology: tpu7x:2x2x1
jax: 0.10.0
libtpu: 0.0.40
codegen_flags: <defaults>
</compile_context>

<pallas_src>
import jax
import jax.numpy as jnp
from jax.experimental import pallas as pl
from jax.experimental.pallas import tpu as pltpu


def _siamese_kernel(x_ref, xs_ref, w1_ref, b1_ref, w2t_ref, scale_ref, bout_ref, p_ref):
    """One-shot Siamese forward for a small batch.

    x_ref    : [B, D]   flattened x (f32)
    xs_ref   : [B, D]   flattened x_sampling (f32)
    w1_ref   : [D, H]   embedding layer 1 weight (f32 or bf16)
    b1_ref   : [1, H]   embedding layer 1 bias (f32)
    w2t_ref  : [L, H]   embedding layer 2 weight, TRANSPOSED (rows lane-dense, f32)
    scale_ref: [1, L]   scaling_factor * w_out folded at prep time (f32)
    bout_ref : [1]      SMEM: output-Linear bias scalar (f32)
    p_ref    : [B, 1]   sigmoid probabilities (output)
    """
    w1 = w1_ref[...]
    b1 = b1_ref[...]

    # ---- embedding layer 1: two small MXU matmuls against the resident w1 ----
    # Activations are cast to the weight dtype at vreg level (no-op when f32);
    # accumulation stays f32 via preferred_element_type on every TPU generation.
    h = jnp.dot(x_ref[...].astype(w1.dtype), w1, preferred_element_type=jnp.float32)
    hs = jnp.dot(xs_ref[...].astype(w1.dtype), w1, preferred_element_type=jnp.float32)
    h = jnp.maximum(h + b1, 0.0)
    hs = jnp.maximum(hs + b1, 0.0)

    # ---- embedding layer 2 + Siamese head ----
    # b2 cancels exactly in (z - z_sampling): project the branch *difference*.
    d = h - hs                                                       # [B, H]

    # K=hidden, N=latent(=2) is far too small to pay an MXU round trip: one broadcast
    # multiply + one lane reduction on the VPU/XLU instead (MXU stays free).
    zdiff = jnp.sum(d[:, None, :] * w2t_ref[...][None, :, :], axis=-1)   # [B, L]

    # |z - zs| * (scaling_factor * w_out), summed over latent, plus output bias.
    logits = jnp.sum(jnp.abs(zdiff) * scale_ref[...], axis=-1, keepdims=True)
    logits = logits + bout_ref[0]                                    # [B, 1]

    # Exact sigmoid (EUP exp + plain divide): free at this size, full f32 accuracy.
    p_ref[...] = 1.0 / (1.0 + jnp.exp(-logits))


def prepare_params(params, *, use_bf16_mxu=False):
    """One-time parameter prep, hoisted OUT of the per-call path.

    Folds scaling_factor * w_out, transposes w2, and (optionally) stores w1 in bf16
    to halve its HBM->VMEM bytes.  b2 is dropped because it cancels in z - z_sampling.
    """
    w1 = params["w1"].astype(jnp.bfloat16 if use_bf16_mxu else jnp.float32)
    return {
        "w1": w1,
        "b1": params["b1"].astype(jnp.float32).reshape(1, -1),
        "w2t": jnp.transpose(params["w2"]).astype(jnp.float32),               # [L, H]
        "scale": (params["scaling_factor"] * params["w_out"])
                 .astype(jnp.float32).reshape(1, -1),                          # [1, L]
        "b_out": params["b_out"].astype(jnp.float32).reshape(-1),              # [1]
    }


@jax.jit
def siamese_forward(x, x_sampling, is_the_sample_class, prep):
    """Flattens NCHW inputs (the `Flatten` spec) and runs the fused Pallas kernel."""
    B = x.shape[0]
    # Flatten == torch .view(B, -1): a free metadata reshape of contiguous NCHW.
    x_flat = x.reshape(B, -1).astype(jnp.float32)
    xs_flat = x_sampling.reshape(B, -1).astype(jnp.float32)

    vmem = pl.BlockSpec(memory_space=pltpu.MemorySpace.VMEM)
    smem = pl.BlockSpec(memory_space=pltpu.MemorySpace.SMEM)

    # grid=() is fine at these shapes; see the TODO at the top of the file for the
    # batch-tiled / megacore-parallel variant when B grows.
    p = pl.pallas_call(
        _siamese_kernel,
        out_shape=jax.ShapeDtypeStruct((B, 1), jnp.float32),
        in_specs=[vmem, vmem, vmem, vmem, vmem, vmem, smem],
        out_specs=vmem,
    )(x_flat, xs_flat, prep["w1"], prep["b1"], prep["w2t"], prep["scale"], prep["b_out"])

    return p.reshape(-1), is_the_sample_class.reshape(-1)


def init_params(key, in_dim, hidden, latent_dims=2):
    ks = jax.random.split(key, 6)
    return {
        # embedding_net: Linear(in_dim, hidden) -> ReLU -> Linear(hidden, latent_dims)
        "w1": jax.random.normal(ks[0], (in_dim, hidden), jnp.float32) * 0.05,
        "b1": jnp.zeros((1, hidden), jnp.float32),
        "w2": jax.random.normal(ks[1], (hidden, latent_dims), jnp.float32) * 0.3,
        "b2": jnp.zeros((1, latent_dims), jnp.float32),
        # self.scaling_factor = nn.Parameter(torch.randn(2))
        "scaling_factor": jax.random.normal(ks[2], (1, latent_dims), jnp.float32),
        # self.output = Sequential(Linear(latent_dims, 1), Sigmoid())
        "w_out": jax.random.normal(ks[3], (1, latent_dims), jnp.float32) * 0.5,
        "b_out": jax.random.normal(ks[4], (1, 1), jnp.float32) * 0.1,
    }


def _reference_forward(x, x_sampling, is_the_sample_class, params):
    """Pure-JAX reference of the original module (correctness check only)."""
    B = x.shape[0]
    xf = x.reshape(B, -1).astype(jnp.float32)
    xsf = x_sampling.reshape(B, -1).astype(jnp.float32)

    def embed(v):
        h = jnp.maximum(v @ params["w1"] + params["b1"], 0.0)
        return h @ params["w2"] + params["b2"]

    z, zs = embed(xf), embed(xsf)
    l1 = jnp.abs(z - zs) * params["scaling_factor"]
    logits = jnp.sum(l1 * params["w_out"], axis=-1, keepdims=True) + params["b_out"]
    p = jax.nn.sigmoid(logits)
    return p.reshape(-1), is_the_sample_class.reshape(-1)


if __name__ == "__main__":
    key = jax.random.PRNGKey(0)
    k_x, k_xs, k_lbl, k_p = jax.random.split(key, 4)

    B, C, H, W = 2, 4, 16, 16
    hidden, latent_dims = 32, 2
    in_dim = C * H * W

    x = jax.random.normal(k_x, (B, C, H, W), jnp.float32)
    x_sampling = jax.random.normal(k_xs, (B, C, H, W), jnp.float32)
    is_the_sample_class = jax.random.bernoulli(k_lbl, 0.5, (B, 1)).astype(jnp.float32)

    params = init_params(k_p, in_dim, hidden, latent_dims)
    p_ref, labels_ref = _reference_forward(x, x_sampling, is_the_sample_class, params)

    # ---- f32 path: exact-math check (sigmoid no longer uses the approx reciprocal) ----
    prep_f32 = prepare_params(params, use_bf16_mxu=False)
    p_same, labels = siamese_forward(x, x_sampling, is_the_sample_class, prep_f32)
    jax.block_until_ready((p_same, labels))
    assert p_same.shape == (B,) and labels.shape == (B,)
    assert jnp.allclose(p_same, p_ref, atol=1e-5), (p_same, p_ref)
    assert jnp.allclose(labels, labels_ref)

    # ---- bf16-weight MXU path (valid on v5e/v6e/v7x): halves w1 HBM traffic ----
    prep_bf16 = prepare_params(params, use_bf16_mxu=True)
    p_bf16, _ = siamese_forward(x, x_sampling, is_the_sample_class, prep_bf16)
    jax.block_until_ready(p_bf16)
    assert p_bf16.shape == (B,)
    assert jnp.allclose(p_bf16, p_ref, atol=5e-2), (p_bf16, p_ref)

    print("KERNEL_OK")
</pallas_src>

<mosaic_0001>
module attributes {stable_mosaic.version = 11 : i64} {
  func.func @_siamese_kernel(%arg0: memref<2x1024xf32, #tpu.memory_space<vmem>>, %arg1: memref<2x1024xf32, #tpu.memory_space<vmem>>, %arg2: memref<1024x32xf32, #tpu.memory_space<vmem>>, %arg3: memref<1x32xf32, #tpu.memory_space<vmem>>, %arg4: memref<2x32xf32, #tpu.memory_space<vmem>>, %arg5: memref<1x2xf32, #tpu.memory_space<vmem>>, %arg6: memref<1xf32, #tpu.memory_space<smem>>, %arg7: memref<2x1xf32, #tpu.memory_space<vmem>>) attributes {dimension_semantics = [], scalar_prefetch = 0 : i64, scratch_operands = 0 : i64, tpu.core_type = #tpu.core_type<tc>} {
    %c0 = arith.constant 0 : index
    %c0_0 = arith.constant 0 : index
    %0 = vector.load %arg2[%c0, %c0_0] : memref<1024x32xf32, #tpu.memory_space<vmem>>, vector<1024x32xf32>
    %c0_1 = arith.constant 0 : index
    %c0_2 = arith.constant 0 : index
    %1 = vector.load %arg3[%c0_1, %c0_2] : memref<1x32xf32, #tpu.memory_space<vmem>>, vector<1x32xf32>
    %c0_3 = arith.constant 0 : index
    %c0_4 = arith.constant 0 : index
    %2 = vector.load %arg0[%c0_3, %c0_4] : memref<2x1024xf32, #tpu.memory_space<vmem>>, vector<2x1024xf32>
    %cst = arith.constant dense<0.000000e+00> : vector<2x32xf32>
    %3 = tpu.matmul %2, %0, %cst {dimension_numbers = #tpu.dot_dimension_numbers<[1], [0], [0], [1], [0, 0, 1, 1], [], []>} : vector<2x1024xf32>, vector<1024x32xf32>, vector<2x32xf32> -> vector<2x32xf32>
    %c0_5 = arith.constant 0 : index
    %c0_6 = arith.constant 0 : index
    %4 = vector.load %arg1[%c0_5, %c0_6] : memref<2x1024xf32, #tpu.memory_space<vmem>>, vector<2x1024xf32>
    %cst_7 = arith.constant dense<0.000000e+00> : vector<2x32xf32>
    %5 = tpu.matmul %4, %0, %cst_7 {dimension_numbers = #tpu.dot_dimension_numbers<[1], [0], [0], [1], [0, 0, 1, 1], [], []>} : vector<2x1024xf32>, vector<1024x32xf32>, vector<2x32xf32> -> vector<2x32xf32>
    %6 = vector.broadcast %1 : vector<1x32xf32> to vector<2x32xf32>
    %7 = arith.addf %3, %6 : vector<2x32xf32>
    %cst_8 = arith.constant 0.000000e+00 : f32
    %8 = vector.broadcast %cst_8 : f32 to vector<2x32xf32>
    %9 = arith.maximumf %7, %8 : vector<2x32xf32>
    %10 = vector.broadcast %1 : vector<1x32xf32> to vector<2x32xf32>
    %11 = arith.addf %5, %10 : vector<2x32xf32>
    %cst_9 = arith.constant 0.000000e+00 : f32
    %12 = vector.broadcast %cst_9 : f32 to vector<2x32xf32>
    %13 = arith.maximumf %11, %12 : vector<2x32xf32>
    %14 = arith.subf %9, %13 : vector<2x32xf32>
    %15 = vector.shape_cast %14 : vector<2x32xf32> to vector<2x1x32xf32>
    %c0_10 = arith.constant 0 : index
    %c0_11 = arith.constant 0 : index
    %16 = vector.load %arg4[%c0_10, %c0_11] : memref<2x32xf32, #tpu.memory_space<vmem>>, vector<2x32xf32>
    %17 = vector.shape_cast %16 : vector<2x32xf32> to vector<1x2x32xf32>
    %18 = vector.broadcast %15 : vector<2x1x32xf32> to vector<2x2x32xf32>
    %19 = vector.broadcast %17 : vector<1x2x32xf32> to vector<2x2x32xf32>
    %20 = arith.mulf %18, %19 : vector<2x2x32xf32>
    %cst_12 = arith.constant dense<0.000000e+00> : vector<2x2xf32>
    %21 = vector.multi_reduction <add>, %20, %cst_12 [2] : vector<2x2x32xf32> to vector<2x2xf32>
    %22 = math.absf %21 : vector<2x2xf32>
    %c0_13 = arith.constant 0 : index
    %c0_14 = arith.constant 0 : index
    %23 = vector.load %arg5[%c0_13, %c0_14] : memref<1x2xf32, #tpu.memory_space<vmem>>, vector<1x2xf32>
    %24 = vector.broadcast %23 : vector<1x2xf32> to vector<2x2xf32>
    %25 = arith.mulf %22, %24 : vector<2x2xf32>
    %cst_15 = arith.constant dense<0.000000e+00> : vector<2xf32>
    %26 = vector.multi_reduction <add>, %25, %cst_15 [1] : vector<2x2xf32> to vector<2xf32>
    %27 = vector.shape_cast %26 : vector<2xf32> to vector<2x1xf32>
    %c0_16 = arith.constant 0 : index
    %28 = memref.load %arg6[%c0_16] : memref<1xf32, #tpu.memory_space<smem>>
    %29 = vector.broadcast %28 : f32 to vector<2x1xf32>
    %30 = arith.addf %27, %29 : vector<2x1xf32>
    %cst_17 = arith.constant 0.000000e+00 : f32
    %31 = vector.broadcast %cst_17 : f32 to vector<2x1xf32>
    %32 = arith.subf %31, %30 : vector<2x1xf32>
    %33 = math.exp %32 : vector<2x1xf32>
    %cst_18 = arith.constant 1.000000e+00 : f32
    %34 = vector.broadcast %cst_18 : f32 to vector<2x1xf32>
    %35 = arith.addf %34, %33 : vector<2x1xf32>
    %cst_19 = arith.constant 1.000000e+00 : f32
    %36 = vector.broadcast %cst_19 : f32 to vector<2x1xf32>
    %37 = arith.divf %36, %35 : vector<2x1xf32>
    %c0_20 = arith.constant 0 : index
    %c0_21 = arith.constant 0 : index
    %38 = vector.load %arg7[%c0_20, %c0_21] : memref<2x1xf32, #tpu.memory_space<vmem>>, vector<2x1xf32>
    tpu.vector_store %arg7[%c0_20, %c0_21], %37 {strides = array<i32>} : memref<2x1xf32, #tpu.memory_space<vmem>>, vector<2x1xf32>,
    return
  }
}

</mosaic_0001>

<bundles_post_ra>
// kernel: siamese_forward.1
= control target key start
LH: loop header
LB: loop body
LE: loop exit
PB: predicated region body
PF: predicated region fallthrough
CT: control target
= control target key end

     0   :  { %v1465_v47 = vmov 1983009808   ;;  %v2211_v49 = vlaneseq  ;;  %vm853_vm0 = vcmask 254976   ;;  %vm892_vm1 = vcmask 1041409   ;;  %s2203_s2 = inlined_call_operand.vmem [shape: f32[1024,32], index: 2, kind: input, shape index: {}]   ;;  %s2204_s0 = inlined_call_operand.vmem [shape: f32[2,1024], index: 0, kind: input, shape index: {}]   ;;  %s2205_s1 = inlined_call_operand.vmem [shape: f32[2,1024], index: 1, kind: input, shape index: {}]   ;;  %s2206_s5 = inlined_call_operand.vmem [shape: f32[1,2], index: 5, kind: input, shape index: {}]   ;;  %s2207_s3 = inlined_call_operand.vmem [shape: f32[1,32], index: 3, kind: input, shape index: {}]   ;;  %s2208_s4 = inlined_call_operand.vmem [shape: f32[2,32], index: 4, kind: input, shape index: {}]   ;;  %s2209_s6 = inlined_call_operand.<no memory space> [shape: f32[1], index: 6, kind: input, shape index: {}]   ;;  %s2210_s7 = inlined_call_operand.vmem [shape: f32[2,1], index: 7, kind: output, shape index: {}]  }
   0x1   :  { %v43_v0 = vld [vmem:[%s2203_s2 + $0x80] sm:$0xff]  ;;  %v44_v1 = vld [vmem:[%s2203_s2 + $0x88] sm:$0xff]  ;;  %v45_v11 = vld [vmem:[%s2203_s2 + $0x90] sm:$0xff]  ;;  %v170_v48 = vunpack.c.l.s4 %v1465_v47  ;;  %vm895_vm2 = vcmask 9216   ;;  %vm908_vm3 = vcmask 1024  }
   0x2   :  { %v27_v2 = vld [vmem:[%s2203_s2] sm:$0xff]  ;;  %v1517_v3 = vpack.c.bf16 %v44_v1, %v43_v0  ;;  %v28_v4 = vld [vmem:[%s2203_s2 + $0x8] sm:$0xff]  ;;  %v46_v13 = vld [vmem:[%s2203_s2 + $0x98] sm:$0xff]  ;;  %v1685_v0 = vshrl.u32 %v2211_v49, 7 }
   0x3   :  { %v75_v5 = vld [vmem:[%s2203_s2 + $0x180] sm:$0xff]  ;;  %v76_v6 = vld [vmem:[%s2203_s2 + $0x188] sm:$0xff]  ;;  %v1528_v7 = vpack.c.bf16 %v28_v4, %v27_v2  ;;  %v29_v14 = vld [vmem:[%s2203_s2 + $0x10] sm:$0xff]  ;;  %v1555_v16 = vpack.c.bf16 %v46_v13, %v45_v11  ;;  %v171_v63 = vunpack.c.0.s8 %v170_v48 }
   0x4   :  { %v1530_v8 = vpack.c.bf16 %v76_v6, %v75_v5  ;;  %v59_v9 = vld [vmem:[%s2203_s2 + $0x100] sm:$0xff]  ;;  %v60_v10 = vld [vmem:[%s2203_s2 + $0x108] sm:$0xff]  ;;  %1197 = vmatprep.subr.bf16.mxu0 %v1517_v3  ;;  %v30_v15 = vld [vmem:[%s2203_s2 + $0x18] sm:$0xff]  ;;  %2225 = vst [vmem:[#allocation3_spill] sm:$0xff] %v1685_v0 }
   0x5   :  { %v1542_v12 = vpack.c.bf16 %v60_v10, %v59_v9  ;;  %1199 = vmatpush3.bf16.msra.mxu0 %v1528_v7  ;;  %v1557_v17 = vpack.c.bf16 %v30_v15, %v29_v14  ;;  %v77_v18 = vld [vmem:[%s2203_s2 + $0x190] sm:$0xff]  ;;  %v78_v19 = vld [vmem:[%s2203_s2 + $0x198] sm:$0xff]  ;;  %v47_v23 = vld [vmem:[%s2203_s2 + $0xa0] sm:$0xff] }
   0x6   :  { %1229 = vmatprep.subr.bf16.mxu1 %v1530_v8  ;;  %v61_v20 = vld [vmem:[%s2203_s2 + $0x110] sm:$0xff]  ;;  %v1569_v21 = vpack.c.bf16 %v78_v19, %v77_v18  ;;  %v62_v22 = vld [vmem:[%s2203_s2 + $0x118] sm:$0xff]  ;;  %v48_v24 = vld [vmem:[%s2203_s2 + $0xa8] sm:$0xff]  ;;  %1201 = vmatprep.subr.bf16.mxu0 %v1555_v16  ;;  %v1724_v19 = vsub.s32 %v171_v63, %v1685_v0 }
   0x7   :  { %1231 = vmatpush3.bf16.msra.mxu1 %v1542_v12  ;;  %v1581_v25 = vpack.c.bf16 %v62_v22, %v61_v20  ;;  %v1583_v26 = vpack.c.bf16 %v48_v24, %v47_v23  ;;  %v31_v27 = vld [vmem:[%s2203_s2 + $0x20] sm:$0xff]  ;;  %v32_v28 = vld [vmem:[%s2203_s2 + $0x28] sm:$0xff]  ;;  %v49_v35 = vld [vmem:[%s2203_s2 + $0xb0] sm:$0xff] }
   0x8   :  { %v79_v29 = vld [vmem:[%s2203_s2 + $0x1a0] sm:$0xff]  ;;  %1233 = vmatprep.subr.bf16.mxu1 %v1569_v21  ;;  %v80_v30 = vld [vmem:[%s2203_s2 + $0x1a8] sm:$0xff]  ;;  %v1605_v33 = vpack.c.bf16 %v32_v28, %v31_v27  ;;  %v50_v36 = vld [vmem:[%s2203_s2 + $0xb8] sm:$0xff] }
   0x9   :  { %v63_v31 = vld [vmem:[%s2203_s2 + $0x120] sm:$0xff]  ;;  %v64_v32 = vld [vmem:[%s2203_s2 + $0x128] sm:$0xff]  ;;  %1203 = vmatpush3.bf16.msra.mxu0 %v1557_v17  ;;  %v1607_v34 = vpack.c.bf16 %v80_v30, %v79_v29  ;;  %v33_v37 = vld [vmem:[%s2203_s2 + $0x30] sm:$0xff]  ;;  %v1622_v39 = vpack.c.bf16 %v50_v36, %v49_v35 }
   0xa   :  { %1205 = vmatprep.subr.bf16.mxu0 %v1583_v26  ;;  %v1620_v38 = vpack.c.bf16 %v64_v32, %v63_v31  ;;  %v34_v40 = vld [vmem:[%s2203_s2 + $0x38] sm:$0xff]  ;;  %v81_v41 = vld [vmem:[%s2203_s2 + $0x1b0] sm:$0xff]  ;;  %v51_v46 = vld [vmem:[%s2203_s2 + $0xc0] sm:$0xff] }
   0xb   :  { %1235 = vmatpush3.bf16.msra.mxu1 %v1581_v25  ;;  %v82_v42 = vld [vmem:[%s2203_s2 + $0x1b8] sm:$0xff]  ;;  %v65_v44 = vld [vmem:[%s2203_s2 + $0x130] sm:$0xff]  ;;  %v52_v50 = vld [vmem:[%s2203_s2 + $0xc8] sm:$0xff]  ;;  %v1649_v51 = vpack.c.bf16 %v34_v40, %v33_v37 }
   0xc   :  { %1237 = vmatprep.subr.bf16.mxu1 %v1607_v34  ;;  %v1634_v43 = vpack.c.bf16 %v82_v42, %v81_v41  ;;  %v66_v45 = vld [vmem:[%s2203_s2 + $0x138] sm:$0xff]  ;;  %v83_v52 = vld [vmem:[%s2203_s2 + $0x1c0] sm:$0xff]  ;;  %v84_v53 = vld [vmem:[%s2203_s2 + $0x1c8] sm:$0xff]  ;;  %v1661_v55 = vpack.c.bf16 %v52_v50, %v51_v46 }
   0xd   :  { %1207 = vmatpush3.bf16.msra.mxu0 %v1605_v33  ;;  %v1659_v54 = vpack.c.bf16 %v66_v45, %v65_v44  ;;  %v35_v56 = vld [vmem:[%s2203_s2 + $0x40] sm:$0xff]  ;;  %v36_v57 = vld [vmem:[%s2203_s2 + $0x48] sm:$0xff]  ;;  %v1673_v59 = vpack.c.bf16 %v84_v53, %v83_v52  ;;  %v53_v61 = vld [vmem:[%s2203_s2 + $0xd0] sm:$0xff] }
   0xe   :  { %1209 = vmatprep.subr.bf16.mxu0 %v1622_v39  ;;  %v67_v58 = vld [vmem:[%s2203_s2 + $0x140] sm:$0xff]  ;;  %v68_v60 = vld [vmem:[%s2203_s2 + $0x148] sm:$0xff]  ;;  %v54_v62 = vld [vmem:[%s2203_s2 + $0xd8] sm:$0xff]  ;;  %v1694_v4 = vpack.c.bf16 %v36_v57, %v35_v56 }
   0xf   :  { %1239 = vmatpush3.bf16.msra.mxu1 %v1620_v38  ;;  %v85_v1 = vld [vmem:[%s2203_s2 + $0x1d0] sm:$0xff]  ;;  %v86_v2 = vld [vmem:[%s2203_s2 + $0x1d8] sm:$0xff]  ;;  %v1698_v5 = vpack.c.bf16 %v68_v60, %v67_v58  ;;  %v1700_v6 = vpack.c.bf16 %v54_v62, %v53_v61  ;;  %v55_v15 = vld [vmem:[%s2203_s2 + $0xe0] sm:$0xff] }
  0x10   :  { %1241 = vmatprep.subr.bf16.mxu1 %v1634_v43  ;;  %v37_v9 = vld [vmem:[%s2203_s2 + $0x50] sm:$0xff]  ;;  %v38_v10 = vld [vmem:[%s2203_s2 + $0x58] sm:$0xff]  ;;  %v1712_v13 = vpack.c.bf16 %v86_v2, %v85_v1  ;;  %v56_v18 = vld [vmem:[%s2203_s2 + $0xe8] sm:$0xff] }
  0x11   :  { %1211 = vmatpush3.bf16.msra.mxu0 %v1649_v51  ;;  %v69_v11 = vld [vmem:[%s2203_s2 + $0x150] sm:$0xff]  ;;  %v70_v14 = vld [vmem:[%s2203_s2 + $0x158] sm:$0xff]  ;;  %v87_v20 = vld [vmem:[%s2203_s2 + $0x1e0] sm:$0xff]  ;;  %v1733_v23 = vpack.c.bf16 %v38_v10, %v37_v9  ;;  %v1742_v28 = vpack.c.bf16 %v56_v18, %v55_v15 }
  0x12   :  { %1213 = vmatprep.subr.bf16.mxu0 %v1661_v55  ;;  %v88_v22 = vld [vmem:[%s2203_s2 + $0x1e8] sm:$0xff]  ;;  %v39_v24 = vld [vmem:[%s2203_s2 + $0x60] sm:$0xff]  ;;  %v1740_v27 = vpack.c.bf16 %v70_v14, %v69_v11  ;;  %v57_v36 = vld [vmem:[%s2203_s2 + $0xf0] sm:$0xff] }
  0x13   :  { %1243 = vmatpush3.bf16.msra.mxu1 %v1659_v54  ;;  %v40_v29 = vld [vmem:[%s2203_s2 + $0x68] sm:$0xff]  ;;  %v71_v30 = vld [vmem:[%s2203_s2 + $0x160] sm:$0xff]  ;;  %v1754_v32 = vpack.c.bf16 %v88_v22, %v87_v20  ;;  %v58_v37 = vld [vmem:[%s2203_s2 + $0xf8] sm:$0xff] }
  0x14   :  { %1245 = vmatprep.subr.bf16.mxu1 %v1673_v59  ;;  %v156_v31 = vld [vmem:[%s2204_s0] sm:$0xff]  ;;  %v72_v35 = vld [vmem:[%s2203_s2 + $0x168] sm:$0xff]  ;;  %v89_v42 = vld [vmem:[%s2203_s2 + $0x1f0] sm:$0xff]  ;;  %v1773_v45 = vpack.c.bf16 %v40_v29, %v39_v24  ;;  %v1783_v52 = vpack.c.bf16 %v58_v37, %v57_v36 }
  0x15   :  { %1215 = vmatpush3.bf16.msra.mxu0 %v1694_v4  ;;  %v175_v40 = vrot.slane %v156_v31, %v1724_v19  ;;  %v168_v41 = vcombine.high %v156_v31, %v156_v31  ;;  %v90_v44 = vld [vmem:[%s2203_s2 + $0x1f8] sm:$0xff]  ;;  %v157_v46 = vld [vmem:[%s2204_s0 + $0x8] sm:$0xff]  ;;  %v1781_v50 = vpack.c.bf16 %v72_v35, %v71_v30  ;;  %v41_v53 = vld [vmem:[%s2203_s2 + $0x70] sm:$0xff] }
  0x16   :  { %1217 = vmatprep.subr.bf16.mxu0 %v1700_v6  ;;  %v42_v56 = vld [vmem:[%s2203_s2 + $0x78] sm:$0xff]  ;;  %v73_v57 = vld [vmem:[%s2203_s2 + $0x170] sm:$0xff]  ;;  %v1795_v58 = vpack.c.bf16 %v90_v44, %v89_v42  ;;  %v107_v61 = vld [vmem:[%s2203_s2 + $0x280] sm:$0xff]  ;;  %v185_v1 = vcombine.high %v157_v46, %v157_v46  ;;  %v1843_v31 = vrot.slane %v157_v46, %v1724_v19 }
  0x17   :  { %1247 = vmatpush3.bf16.msra.mxu1 %v1698_v5  ;;  %v183_v47 = vcombine.high %v175_v40, %v175_v40  ;;  %v182_v48 = vrot.slane %v168_v41, %v1724_v19  ;;  %v74_v60 = vld [vmem:[%s2203_s2 + $0x178] sm:$0xff]  ;;  %v108_v62 = vld [vmem:[%s2203_s2 + $0x288] sm:$0xff]  ;;  %v139_v2 = vld [vmem:[%s2203_s2 + $0x380] sm:$0xff]  ;;  %v1813_v10 = vpack.c.bf16 %v42_v56, %v41_v53 }
  0x18   :  { %1249 = vmatprep.subr.bf16.mxu1 %v1712_v13  ;;  %v140_v9 = vld [vmem:[%s2203_s2 + $0x388] sm:$0xff]  ;;  %v1817_v11 = vpack.c.bf16 %v74_v60, %v73_v57  ;;  %v1819_v14 = vpack.c.bf16 %v108_v62, %v107_v61  ;;  %v91_v15 = vld [vmem:[%s2203_s2 + $0x200] sm:$0xff]  ;;  %v109_v29 = vld [vmem:[%s2203_s2 + $0x290] sm:$0xff]  ;;  %v1852_v37 = vrot.slane %v185_v1, %v1724_v19  ;;  %v200_v62 = vcombine.high %v1843_v31, %v1843_v31 }
  0x19   :  { %1219 = vmatpush3.bf16.msra.mxu0 %v1733_v23  ;;  %274 = vmatprep.mubr.f32.mxu0 %v183_v47  ;;  %v184_v63 = vcombine.high %v182_v48, %v182_v48  ;;  %v92_v18 = vld [vmem:[%s2203_s2 + $0x208] sm:$0xff]  ;;  %v123_v20 = vld [vmem:[%s2203_s2 + $0x300] sm:$0xff]  ;;  %v1831_v22 = vpack.c.bf16 %v140_v9, %v139_v2  ;;  %v110_v30 = vld [vmem:[%s2203_s2 + $0x298] sm:$0xff] }
  0x1a   :  { %1221 = vmatprep.subr.bf16.mxu0 %v1742_v28  ;;  %v124_v24 = vld [vmem:[%s2203_s2 + $0x308] sm:$0xff]  ;;  %v141_v35 = vld [vmem:[%s2203_s2 + $0x390] sm:$0xff]  ;;  %v142_v36 = vld [vmem:[%s2203_s2 + $0x398] sm:$0xff]  ;;  %v1855_v41 = vpack.c.bf16 %v92_v18, %v91_v15  ;;  %v1861_v44 = vpack.c.bf16 %v110_v30, %v109_v29  ;;  %v201_v2 = vcombine.high %v1852_v37, %v1852_v37 }
  0x1b   :  { %1251 = vmatpush3.bf16.msra.mxu1 %v1740_v27  ;;  %344 = vmatprep.mubr.f32.mxu1 %v184_v63  ;;  %v1859_v42 = vpack.c.bf16 %v124_v24, %v123_v20  ;;  %v93_v46 = vld [vmem:[%s2203_s2 + $0x210] sm:$0xff]  ;;  %v94_v47 = vld [vmem:[%s2203_s2 + $0x218] sm:$0xff]  ;;  %v1873_v56 = vpack.c.bf16 %v142_v36, %v141_v35  ;;  %v111_v60 = vld [vmem:[%s2203_s2 + $0x2a0] sm:$0xff] }
  0x1c   :  { %1253 = vmatprep.subr.bf16.mxu1 %v1754_v32  ;;  %v125_v53 = vld [vmem:[%s2203_s2 + $0x310] sm:$0xff]  ;;  %v126_v57 = vld [vmem:[%s2203_s2 + $0x318] sm:$0xff]  ;;  %v112_v61 = vld [vmem:[%s2203_s2 + $0x2a8] sm:$0xff]  ;;  %v1895_v9 = vpack.c.bf16 %v94_v47, %v93_v46 }
  0x1d   :  { %1223 = vmatpush3.bf16.msra.mxu0 %v1773_v45  ;;  %v143_v63 = vld [vmem:[%s2203_s2 + $0x3a0] sm:$0xff]  ;;  %v144_v1 = vld [vmem:[%s2203_s2 + $0x3a8] sm:$0xff]  ;;  %v1901_v15 = vpack.c.bf16 %v112_v61, %v111_v60  ;;  %v113_v30 = vld [vmem:[%s2203_s2 + $0x2b0] sm:$0xff] }
  0x1e   :  { %1225 = vmatprep.subr.bf16.mxu0 %v1783_v52  ;;  %v95_v18 = vld [vmem:[%s2203_s2 + $0x220] sm:$0xff]  ;;  %v96_v20 = vld [vmem:[%s2203_s2 + $0x228] sm:$0xff]  ;;  %v1913_v24 = vpack.c.bf16 %v144_v1, %v143_v63  ;;  %v114_v35 = vld [vmem:[%s2203_s2 + $0x2b8] sm:$0xff] }
  0x1f   :  { %1255 = vmatpush3.bf16.msra.mxu1 %v1781_v50  ;;  %v128_v29 = vld [vmem:[%s2203_s2 + $0x328] sm:$0xff]  ;;  %v145_v36 = vld [vmem:[%s2203_s2 + $0x3b0] sm:$0xff]  ;;  %v146_v46 = vld [vmem:[%s2203_s2 + $0x3b8] sm:$0xff]  ;;  %v1931_v47 = vpack.c.bf16 %v96_v20, %v95_v18 }
  0x20   :  { %1257 = vmatprep.subr.bf16.mxu1 %v1795_v58  ;;  %v97_v60 = vld [vmem:[%s2203_s2 + $0x230] sm:$0xff]  ;;  %v98_v61 = vld [vmem:[%s2203_s2 + $0x238] sm:$0xff]  ;;  %v1949_v63 = vpack.c.bf16 %v146_v46, %v145_v36  ;;  %v116_v18 = vld [vmem:[%s2203_s2 + $0x2c8] sm:$0xff] }
  0x21   :  { %1227 = vmatpush3.bf16.msra.mxu0 %v1813_v10  ;;  %v130_v1 = vld [vmem:[%s2203_s2 + $0x338] sm:$0xff]  ;;  %v147_v20 = vld [vmem:[%s2203_s2 + $0x3c0] sm:$0xff]  ;;  %v100_v46 = vld [vmem:[%s2203_s2 + $0x248] sm:$0xff] }
  0x22   :  { %1261 = vmatprep.subr.bf16.mxu0 %v1819_v14  ;;  %2227 = vst [vmem:[#allocation5_spill] sm:$0xff] %v1949_v63  ;;  %v99_v36 = vld [vmem:[%s2203_s2 + $0x240] sm:$0xff] }
  0x23   :  { %1259 = vmatpush3.bf16.msra.mxu1 %v1817_v11 }
  0x24   :  { %1293 = vmatprep.subr.bf16.mxu1 %v1831_v22  ;;  %275 = vmatmul.mubr.f32.vlgmr.msra.gmra.mrb[0].mxu0 %v175_v40  ;;  %v1899_v40 = vpack.c.bf16 %v126_v57, %v125_v53  ;;  %v1937_v57 = vpack.c.bf16 %v114_v35, %v113_v30 }
  0x25   :  { %1263 = vmatpush3.bf16.msra.mxu0 %v1855_v41  ;;  %414 = vmatprep.mubr.f32.mxu0 %v200_v62  ;;  %v129_v62 = vld [vmem:[%s2203_s2 + $0x330] sm:$0xff] }
  0x26   :  { %345 = vmatmul.mubr.f32.vlgmr.msra.gmra.mrb[0].mxu1 %v182_v48  ;;  %1265 = vmatprep.subr.bf16.mxu0 %v1861_v44  ;;  %v127_v48 = vld [vmem:[%s2203_s2 + $0x320] sm:$0xff]  ;;  %2226 = vst [vmem:[#allocation4_spill] sm:$0xff] %v1937_v57  ;;  %v1971_v30 = vpack.c.bf16 %v130_v1, %v129_v62  ;;  %v132_v62 = vld [vmem:[%s2203_s2 + $0x348] sm:$0xff]  ;;  %v117_v1 = vld [vmem:[%s2203_s2 + $0x2d0] sm:$0xff] }
  0x27   :  { %1295 = vmatpush3.bf16.msra.mxu1 %v1859_v42  ;;  %484 = vmatprep.mubr.f32.mxu1 %v201_v2  ;;  %v1935_v53 = vpack.c.bf16 %v128_v29, %v127_v48  ;;  %v115_v2 = vld [vmem:[%s2203_s2 + $0x2c0] sm:$0xff]  ;;  %v148_v48 = vld [vmem:[%s2203_s2 + $0x3c8] sm:$0xff]  ;;  %v1967_v29 = vpack.c.bf16 %v98_v61, %v97_v60 }
  0x28   :  { %1297 = vmatprep.subr.bf16.mxu1 %v1873_v56  ;;  %2229 = vst [vmem:[#allocation7_spill] sm:$0xff] %v1971_v30  ;;  %v1973_v35 = vpack.c.bf16 %v116_v18, %v115_v2  ;;  %v131_v60 = vld [vmem:[%s2203_s2 + $0x340] sm:$0xff]  ;;  %v1985_v61 = vpack.c.bf16 %v148_v48, %v147_v20  ;;  %v118_v2 = vld [vmem:[%s2203_s2 + $0x2d8] sm:$0xff]  ;;  %v149_v18 = vld [vmem:[%s2203_s2 + $0x3d0] sm:$0xff]  ;;  %v2003_v48 = vpack.c.bf16 %v100_v46, %v99_v36 }
  0x29   :  { %1267 = vmatpush3.bf16.msra.mxu0 %v1895_v9  ;;  %2228 = vst [vmem:[#allocation6_spill] sm:$0xff] %v1967_v29  ;;  %v150_v20 = vld [vmem:[%s2203_s2 + $0x3d8] sm:$0xff]  ;;  %v2007_v49 = vpack.c.bf16 %v132_v62, %v131_v60  ;;  %v2009_v0 = vpack.c.bf16 %v118_v2, %v117_v1  ;;  %v133_v36 = vld [vmem:[%s2203_s2 + $0x350] sm:$0xff]  ;;  %v119_v62 = vld [vmem:[%s2203_s2 + $0x2e0] sm:$0xff] }
  0x2a   :  { %1269 = vmatprep.subr.bf16.mxu0 %v1901_v15  ;;  %2230 = vst [vmem:[#allocation8_spill] sm:$0xff] %v1973_v35  ;;  %2231 = vst [vmem:[#allocation9_spill] sm:$0xff] %v1985_v61  ;;  %v2021_v46 = vpack.c.bf16 %v150_v20, %v149_v18  ;;  %v134_v60 = vld [vmem:[%s2203_s2 + $0x358] sm:$0xff]  ;;  %v120_v1 = vld [vmem:[%s2203_s2 + $0x2e8] sm:$0xff] }
  0x2b   :  { %1299 = vmatpush3.bf16.msra.mxu1 %v1899_v40  ;;  %2232 = vst [vmem:[#allocation10_spill] sm:$0xff] %v2003_v48  ;;  %2233 = vst [vmem:[#allocation11_spill] sm:$0xff] %v2007_v49  ;;  %v151_v2 = vld [vmem:[%s2203_s2 + $0x3e0] sm:$0xff]  ;;  %v152_v18 = vld [vmem:[%s2203_s2 + $0x3e8] sm:$0xff] }
  0x2c   :  { %1301 = vmatprep.subr.bf16.mxu1 %v1913_v24  ;;  %2234 = vst [vmem:[#allocation12_spill] sm:$0xff] %v2009_v0  ;;  %2235 = vst [vmem:[#allocation13_spill] sm:$0xff] %v2021_v46 }
  0x2d   :  { %1271 = vmatpush3.bf16.msra.mxu0 %v1931_v47 }
  0x2e   :  { %1273 = vmatprep.subr.bf16.mxu0 %v1937_v57  ;;  %v102_v57 = vld [vmem:[%s2203_s2 + $0x258] sm:$0xff] }
  0x2f   :  { %1303 = vmatpush3.bf16.msra.mxu1 %v1935_v53 }
  0x30   :  { %1305 = vmatprep.subr.bf16.mxu1 %v1949_v63  ;;  %v101_v63 = vld [vmem:[%s2203_s2 + $0x250] sm:$0xff] }
  0x31   :  { %1275 = vmatpush3.bf16.msra.mxu0 %v1967_v29  ;;  %v2039_v20 = vpack.c.bf16 %v102_v57, %v101_v63  ;;  %v104_v29 = vld [vmem:[%s2203_s2 + $0x268] sm:$0xff]  ;;  %v135_v57 = vld [vmem:[%s2203_s2 + $0x360] sm:$0xff]  ;;  %v2057_v63 = vpack.c.bf16 %v152_v18, %v151_v2  ;;  %v154_v2 = vld [vmem:[%s2203_s2 + $0x3f8] sm:$0xff] }
  0x32   :  { %1277 = vmatprep.subr.bf16.mxu0 %v1973_v35  ;;  %v2045_v35 = vpack.c.bf16 %v120_v1, %v119_v62  ;;  %v122_v62 = vld [vmem:[%s2203_s2 + $0x2f8] sm:$0xff]  ;;  %v153_v1 = vld [vmem:[%s2203_s2 + $0x3f0] sm:$0xff] }
  0x33   :  { %1307 = vmatpush3.bf16.msra.mxu1 %v1971_v30  ;;  %v103_v30 = vld [vmem:[%s2203_s2 + $0x260] sm:$0xff] }
  0x34   :  { %1309 = vmatprep.subr.bf16.mxu1 %v1985_v61  ;;  %v2043_v61 = vpack.c.bf16 %v134_v60, %v133_v36  ;;  %2236 = vst [vmem:[#allocation14_spill] sm:$0xff] %v2045_v35  ;;  %v136_v36 = vld [vmem:[%s2203_s2 + $0x368] sm:$0xff]  ;;  %v121_v60 = vld [vmem:[%s2203_s2 + $0x2f0] sm:$0xff]  ;;  %v2075_v18 = vpack.c.bf16 %v104_v29, %v103_v30  ;;  %v106_v29 = vld [vmem:[%s2203_s2 + $0x278] sm:$0xff]  ;;  %v2093_v30 = vpack.c.bf16 %v154_v2, %v153_v1 }
  0x35   :  { %1279 = vmatpush3.bf16.msra.mxu0 %v2003_v48  ;;  %v105_v48 = vld [vmem:[%s2203_s2 + $0x270] sm:$0xff] }
  0x36   :  { %1281 = vmatprep.subr.bf16.mxu0 %v2009_v0  ;;  %v2082_v0 = vpack.c.bf16 %v136_v36, %v135_v57  ;;  %v138_v57 = vld [vmem:[%s2203_s2 + $0x378] sm:$0xff] }
  0x37   :  { %1311 = vmatpush3.bf16.msra.mxu1 %v2007_v49  ;;  %v2084_v49 = vpack.c.bf16 %v122_v62, %v121_v60  ;;  %v2102_v60 = vpack.c.bf16 %v106_v29, %v105_v48 }
  0x38   :  { %1313 = vmatprep.subr.bf16.mxu1 %v2021_v46  ;;  %v158_v46 = vld [vmem:[%s2205_s1] sm:$0xff] }
  0x39   :  { %1283 = vmatpush3.bf16.msra.mxu0 %v2039_v20  ;;  %v493_v36 = vcombine.high %v158_v46, %v158_v46  ;;  %v500_v1 = vrot.slane %v158_v46, %v1724_v19 }
  0x3a   :  { %1285 = vmatprep.subr.bf16.mxu0 %v2045_v35  ;;  %v137_v35 = vld [vmem:[%s2203_s2 + $0x370] sm:$0xff] }
  0x3b   :  { %1315 = vmatpush3.bf16.msra.mxu1 %v2043_v61  ;;  %v2106_v62 = vpack.c.bf16 %v138_v57, %v137_v35  ;;  %v507_v2 = vrot.slane %v493_v36, %v1724_v19  ;;  %v508_v48 = vcombine.high %v500_v1, %v500_v1  ;;  %v2248_v57 = vld [vmem:[#allocation3_spill] sm:$0xff] }
  0x3c   :  { %1317 = vmatprep.subr.bf16.mxu1 %v2057_v63 }
  0x3d   :  { %1287 = vmatpush3.bf16.msra.mxu0 %v2075_v18  ;;  %v509_v29 = vcombine.high %v507_v2, %v507_v2 }
  0x3e   :  { %1289 = vmatprep.subr.bf16.mxu0 %v2084_v49 }
  0x3f   :  { %1319 = vmatpush3.bf16.msra.mxu1 %v2082_v0 }
  0x40   :  { %1321 = vmatprep.subr.bf16.mxu1 %v2093_v30 }
  0x41   :  { %1291 = vmatpush3.bf16.msra.mxu0 %v2102_v60 }
  0x42   :  { %1325 = vmatprep.subr.bf16.mxu0 %v1517_v3  ;;  %v159_v3 = vld [vmem:[%s2205_s1 + $0x8] sm:$0xff] }
  0x43   :  { %1323 = vmatpush3.bf16.msra.mxu1 %v2106_v62 }
  0x44   :  { %1357 = vmatprep.subr.bf16.mxu1 %v1530_v8  ;;  %415 = vmatmul.mubr.f32.vlgmr.msra.gmra.mrb[2].mxu0 %v1843_v31  ;;  %v517_v8 = vrot.slane %v159_v3, %v1724_v19 }
  0x45   :  { %1327 = vmatpush3.bf16.msra.mxu0 %v1528_v7  ;;  %599 = vmatprep.mubr.f32.mxu0 %v508_v48  ;;  %v510_v7 = vcombine.high %v159_v3, %v159_v3 }
  0x46   :  { %485 = vmatmul.mubr.f32.vlgmr.msra.gmra.mrb[2].mxu1 %v1852_v37  ;;  %1329 = vmatprep.subr.bf16.mxu0 %v1555_v16  ;;  %v525_v16 = vcombine.high %v517_v8, %v517_v8 }
  0x47   :  { %1359 = vmatpush3.bf16.msra.mxu1 %v1542_v12  ;;  %669 = vmatprep.mubr.f32.mxu1 %v509_v29  ;;  %v524_v12 = vrot.slane %v510_v7, %v1724_v19  ;;  %v840_v29 = vld [vmem:[%s2208_s4] sm:$0x3] }
  0x48   :  { %1361 = vmatprep.subr.bf16.mxu1 %v1569_v21  ;;  %v2237_v21 = vld [vmem:[#allocation4_spill] sm:$0xff] }
  0x49   :  { %1331 = vmatpush3.bf16.msra.mxu0 %v1557_v17  ;;  %v526_v17 = vcombine.high %v524_v12, %v524_v12 }
  0x4a   :  { %1333 = vmatprep.subr.bf16.mxu0 %v1583_v26  ;;  %v2239_v26 = vld [vmem:[#allocation6_spill] sm:$0xff] }
  0x4b   :  { %1363 = vmatpush3.bf16.msra.mxu1 %v1581_v25  ;;  %v2238_v25 = vld [vmem:[#allocation5_spill] sm:$0xff] }
  0x4c   :  { %1365 = vmatprep.subr.bf16.mxu1 %v1607_v34  ;;  %v2241_v34 = vld [vmem:[#allocation8_spill] sm:$0xff] }
  0x4d   :  { %1335 = vmatpush3.bf16.msra.mxu0 %v1605_v33  ;;  %v2240_v33 = vld [vmem:[#allocation7_spill] sm:$0xff] }
  0x4e   :  { %1337 = vmatprep.subr.bf16.mxu0 %v1622_v39  ;;  %v2243_v39 = vld [vmem:[#allocation10_spill] sm:$0xff] }
  0x4f   :  { %1367 = vmatpush3.bf16.msra.mxu1 %v1620_v38  ;;  %v2242_v38 = vld [vmem:[#allocation9_spill] sm:$0xff] }
  0x50   :  { %1369 = vmatprep.subr.bf16.mxu1 %v1634_v43  ;;  %v2244_v43 = vld [vmem:[#allocation11_spill] sm:$0xff] }
  0x51   :  { %1339 = vmatpush3.bf16.msra.mxu0 %v1649_v51  ;;  %v2245_v51 = vld [vmem:[#allocation12_spill] sm:$0xff] }
  0x52   :  { %1341 = vmatprep.subr.bf16.mxu0 %v1661_v55  ;;  %v2247_v55 = vld [vmem:[#allocation14_spill] sm:$0xff] }
  0x53   :  { %1371 = vmatpush3.bf16.msra.mxu1 %v1659_v54  ;;  %v2246_v54 = vld [vmem:[#allocation13_spill] sm:$0xff] }
  0x54   :  { %1373 = vmatprep.subr.bf16.mxu1 %v1673_v59  ;;  %v915_v59 = vld [vmem:[%s2206_s5] ss:$0 sm:$0xff] }
  0x55   :  { %1343 = vmatpush3.bf16.msra.mxu0 %v1694_v4  ;;  %869 = vbcast.lane.b32.xlu1 %v915_v59, 256 }
  0x56   :  { %1345 = vmatprep.subr.bf16.mxu0 %v1700_v6 }
  0x57   :  { %1375 = vmatpush3.bf16.msra.mxu1 %v1698_v5 }
  0x58   :  { %1377 = vmatprep.subr.bf16.mxu1 %v1712_v13 }
  0x59   :  { %1347 = vmatpush3.bf16.msra.mxu0 %v1733_v23 }
  0x5a   :  { %1349 = vmatprep.subr.bf16.mxu0 %v1742_v28 }
  0x5b   :  { %1379 = vmatpush3.bf16.msra.mxu1 %v1740_v27 }
  0x5c   :  { %1381 = vmatprep.subr.bf16.mxu1 %v1754_v32 }
  0x5d   :  { %1351 = vmatpush3.bf16.msra.mxu0 %v1773_v45 }
  0x5e   :  { %1353 = vmatprep.subr.bf16.mxu0 %v1783_v52 }
  0x5f   :  { %1383 = vmatpush3.bf16.msra.mxu1 %v1781_v50 }
  0x60   :  { %1385 = vmatprep.subr.bf16.mxu1 %v1795_v58 }
  0x61   :  { %1355 = vmatpush3.bf16.msra.mxu0 %v1813_v10 }
  0x62   :  { %1389 = vmatprep.subr.bf16.mxu0 %v1819_v14 }
  0x63   :  { %1387 = vmatpush3.bf16.msra.mxu1 %v1817_v11 }
  0x64   :  { %1421 = vmatprep.subr.bf16.mxu1 %v1831_v22  ;;  %600 = vmatmul.mubr.f32.vlgmr.msra.gmra.mrb[4].mxu0 %v500_v1  ;;  %v843_v1 = vsub.s32 0, %v2248_v57 }
  0x65   :  { %1391 = vmatpush3.bf16.msra.mxu0 %v1855_v41  ;;  %739 = vmatprep.mubr.f32.mxu0 %v525_v16 }
  0x66   :  { %670 = vmatmul.mubr.f32.vlgmr.msra.gmra.mrb[4].mxu1 %v507_v2  ;;  %1393 = vmatprep.subr.bf16.mxu0 %v1861_v44 }
  0x67   :  { %1423 = vmatpush3.bf16.msra.mxu1 %v1859_v42  ;;  %809 = vmatprep.mubr.f32.mxu1 %v526_v17 }
  0x68   :  { %1425 = vmatprep.subr.bf16.mxu1 %v1873_v56 }
  0x69   :  { %1395 = vmatpush3.bf16.msra.mxu0 %v1895_v9 }
  0x6a   :  { %1397 = vmatprep.subr.bf16.mxu0 %v1901_v15 }
  0x6b   :  { %1427 = vmatpush3.bf16.msra.mxu1 %v1899_v40  ;;  %v1466_v40 = vmov 1966171168  }
  0x6c   :  { %1429 = vmatprep.subr.bf16.mxu1 %v1913_v24  ;;  %v819_v15 = vunpack.c.l.s4 %v1466_v40 }
  0x6d   :  { %1399 = vmatpush3.bf16.msra.mxu0 %v1931_v47 }
  0x6e   :  { %1401 = vmatprep.subr.bf16.mxu0 %v2237_v21 }
  0x6f   :  { %1431 = vmatpush3.bf16.msra.mxu1 %v1935_v53 }
  0x70   :  { %1433 = vmatprep.subr.bf16.mxu1 %v2238_v25  ;;  %v1467_v25 = vmov 0  }
  0x71   :  { %1403 = vmatpush3.bf16.msra.mxu0 %v2239_v26  ;;  %1455 = vset.pattern.permute.xlu1 %v1467_v25 }
  0x72   :  { %1405 = vmatprep.subr.bf16.mxu0 %v2241_v34  ;;  %1456 = vset.pattern.permute.xlu0 %v1467_v25 }
  0x73   :  { %1435 = vmatpush3.bf16.msra.mxu1 %v2240_v33 }
  0x74   :  { %1437 = vmatprep.subr.bf16.mxu1 %v2242_v38 }
  0x75   :  { %1407 = vmatpush3.bf16.msra.mxu0 %v2243_v39 }
  0x76   :  { %1409 = vmatprep.subr.bf16.mxu0 %v2245_v51 }
  0x77   :  { %1439 = vmatpush3.bf16.msra.mxu1 %v2244_v43 }
  0x78   :  { %1441 = vmatprep.subr.bf16.mxu1 %v2246_v54  ;;  %v2249_v54 = vlaneseq }
  0x79   :  { %1411 = vmatpush3.bf16.msra.mxu0 %v2039_v20  ;;  %v820_v20 = vunpack.c.0.s8 %v819_v15 }
  0x7a   :  { %1413 = vmatprep.subr.bf16.mxu0 %v2247_v55  ;;  %v883_v55 = vand.u32 127, %v2249_v54 }
  0x7b   :  { %1443 = vmatpush3.bf16.msra.mxu1 %v2043_v61  ;;  %v823_v36 = vsub.s32 %v820_v20, %v2248_v57 }
  0x7c   :  { %1445 = vmatprep.subr.bf16.mxu1 %v2057_v63  ;;  %v886_v59 = vsub.s32 %v883_v55, %v2248_v57 }
  0x7d   :  { %1415 = vmatpush3.bf16.msra.mxu0 %v2075_v18 }
  0x7e   :  { %1417 = vmatprep.subr.bf16.mxu0 %v2084_v49 }
  0x7f   :  { %1447 = vmatpush3.bf16.msra.mxu1 %v2082_v0  ;;  %v914_v0 = vld [vmem:[%s2207_s3] ss:$0 sm:$0xff] }
  0x80   :  { %1449 = vmatprep.subr.bf16.mxu1 %v2093_v30 }
  0x81   :  { %1419 = vmatpush3.bf16.msra.mxu0 %v2102_v60 }
  0x83   :  { %1451 = vmatpush3.bf16.msra.mxu1 %v2106_v62 }
  0x84   :  { %740 = vmatmul.mubr.f32.vlgmr.msra.gmra.mrb[6].mxu0 %v517_v8 }
  0x86   :  { %810 = vmatmul.mubr.f32.vlgmr.msra.gmra.mrb[6].mxu1 %v524_v12 }
  0xc7   :  { %v870_v33 = vpop.permute.xlu1 %869 }
  0xf7   :  { %v948_v4 = vpop.f32.mrb[0].mxu0 }
  0xf8   :  { %v949_v5 = vpop.f32.mrb[1].mxu0 }
  0xf9   :  { %v983_v49 = vpop.f32.mrb[0].mxu1  ;;  %v950_v6 = vadd.f32 %v949_v5, %v948_v4 }
  0xfa   :  { %v984_v13 = vpop.f32.mrb[1].mxu1 }
  0xfb   :  { %v985_v19 = vadd.f32 %v984_v13, %v983_v49  ;;  %v277_v23 = vadd.f32 %v950_v6, %v914_v0 }
  0xfd   :  { %v347_v27 = vadd.f32 %v985_v19, %v277_v23  ;;  %v900_v19 = vstv %s2209_s6 }
 0x117   :  { %v1018_v28 = vpop.f32.mrb[2].mxu0 }
 0x118   :  { %v1019_v32 = vpop.f32.mrb[3].mxu0 }
 0x119   :  { %v1053_v45 = vpop.f32.mrb[2].mxu1  ;;  %v1020_v50 = vadd.f32 %v1019_v32, %v1018_v28 }
 0x11a   :  { %v1054_v52 = vpop.f32.mrb[3].mxu1 }
 0x11b   :  { %v1055_v58 = vadd.f32 %v1054_v52, %v1053_v45  ;;  %v417_v10 = vadd.f32 %v1020_v50, %v347_v27 }
 0x11d   :  { %v487_v11 = vadd.f32 %v1055_v58, %v417_v10 }
 0x11f   :  { %v490_v18 = vmax.f32 %v487_v11, 0.0 }
 0x137   :  { %v1088_v14 = vpop.f32.mrb[4].mxu0 }
 0x138   :  { %v1089_v22 = vpop.f32.mrb[5].mxu0 }
 0x139   :  { %v1123_v31 = vpop.f32.mrb[4].mxu1  ;;  %v1090_v37 = vadd.f32 %v1089_v22, %v1088_v14 }
 0x13a   :  { %v1124_v41 = vpop.f32.mrb[5].mxu1 }
 0x13b   :  { %v1125_v42 = vadd.f32 %v1124_v41, %v1123_v31  ;;  %v602_v44 = vadd.f32 %v1090_v37, %v914_v0 }
 0x13d   :  { %v672_v56 = vadd.f32 %v1125_v42, %v602_v44 }
 0x157   :  { %v1158_v9 = vpop.f32.mrb[6].mxu0 }
 0x158   :  { %v1159_v24 = vpop.f32.mrb[7].mxu0 }
 0x159   :  { %v1193_v47 = vpop.f32.mrb[6].mxu1  ;;  %v1160_v53 = vadd.f32 %v1159_v24, %v1158_v9 }
 0x15a   :  { %v1194_v35 = vpop.f32.mrb[7].mxu1 }
 0x15b   :  { %v1195_v61 = vadd.f32 %v1194_v35, %v1193_v47  ;;  %v742_v46 = vadd.f32 %v1160_v53, %v672_v56 }
 0x15d   :  { %v812_v63 = vadd.f32 %v1195_v61, %v742_v46 }
 0x15f   :  { %v815_v30 = vmax.f32 %v812_v63, 0.0 }
 0x161   :  { %v816_v60 = vsub.f32 %v490_v18, %v815_v30 }
 0x163   :  { %v824_v62 = vrot.slane %v816_v60, %v823_v36 }
 0x165   :  { %v832_v2 = vrot.slane %v824_v62, %v823_v36  ;;  %v825_v48 = vcombine.high %v824_v62, %v824_v62 }
 0x167   :  { %v844_v3 = vrot.slane %v832_v2, %v843_v1  ;;  %v839_v7 = vrot.slane %v825_v48, %v823_v36 }
 0x169   :  { %v851_v8 = vmul.f32 %v844_v3, %v840_v29  ;;  %v848_v12 = vrot.slane %v839_v7, %v843_v1 }
 0x16b   :  { %v854_v16 = vsel %vm853_vm0, %v851_v8, 0.0  ;;  %v852_v17 = vmul.f32 %v848_v12, %v840_v29 }
 0x16c   :  { %855 = vadd.xlane.f32.xlu0 %v854_v16 }
 0x16d   :  { %v857_v21 = vsel %vm853_vm0, %v852_v17, 0.0 }
 0x170   :  { %858 = vadd.xlane.f32.xlu0 %v857_v21 }
 0x1f9   :  { %v856_v26 = vpop.xlane.xlu0 %855 }
 0x1fa   :  { %v860_v34 = vand.u32 2147483647, %v856_v26 }
 0x1fc   :  { %v872_v38 = vmul.f32 %v870_v33, %v860_v34 }
 0x1fd   :  { %v859_v39 = vpop.xlane.xlu0 %858 }
 0x1fe   :  { %v861_v43 = vand.u32 2147483647, %v859_v39  ;;  %877 = vperm.xlu1 %1455, %v872_v38  }
 0x200   :  { %v873_v51 = vmul.f32 %v870_v33, %v861_v43 }
 0x202   :  { %880 = vperm.xlu0 %1456, %v873_v51  }
 0x27d   :  { %v878_v4 = vpop.permute.xlu1 %877 }
 0x27e   :  { %v887_v5 = vrot.slane %v878_v4, %v886_v59 }
 0x281   :  { %v881_v0 = vpop.permute.xlu0 %880 }
 0x282   :  { %v891_v49 = vrot.slane %v881_v0, %v886_v59 }
 0x284   :  { %v893_v6 = vsel %vm892_vm1, %v891_v49, %v887_v5 }
 0x285   :  { %v896_v13 = vsel %vm895_vm2, %v893_v6, 0.0 }
 0x286   :  { %897 = vadd.xlane.f32.xlu1 %v896_v13 }
 0x313   :  { %v898_v23 = vpop.xlane.xlu1 %897 }
 0x314   :  { %v901_v27 = vadd.f32 %v900_v19, %v898_v23 }
 0x316   :  { %v902_v28 = vsub.f32 0.0, %v901_v27 }
 0x318   :  { %v903_v32 = vmul.f32 1.442695, %v902_v28 }
 0x31a   :  { %1461 = vpow2.f32 %v903_v32 }
 0x324   :  { %v1462_v45 = vpop.eup %1461 }
 0x325   :  { %v905_v50 = vadd.f32 1.0, %v1462_v45 }
 0x327   :  { %1463 = vrcp.f32 %v905_v50 }
 0x331   :  { %v1464_v52 = vpop.eup %1463 }
 0x332   :  { %909 = vst.msk [vmem:[%s2210_s7] sm:$0x3] %vm908_vm3, %v1464_v52 }

</bundles_post_ra>
